<compile_context>
chip_gen: v5e
topology: v5e:2x2
jax: 0.10.0
libtpu: 0.0.40
codegen_flags: <defaults>
</compile_context>

<pallas_src>
import functools

import jax
import jax.numpy as jnp
from jax.experimental import pallas as pl
from jax.experimental.pallas import tpu as pltpu

_MASK_NEG = -1e30  # finite "-inf": keeps the online-softmax update NaN-free


def _global_attention_kernel(q_ref, ctx_ref, mask_ref, wa_ref, wc_ref, wq_ref,
                             o_ref, qproj_ref, m_ref, d_ref, acc_ref):
    li = pl.program_id(1)
    nl = pl.num_programs(1)

    @pl.when(li == 0)
    def _init():
        # q = linear_align(query); weights arrive pre-transposed -> plain x @ W.
        qp = jnp.dot(q_ref[...], wa_ref[...], preferred_element_type=jnp.float32)
        qproj_ref[...] = qp[:, None, :]                          # (tb, 1, H)
        m_ref[...] = jnp.full_like(m_ref, _MASK_NEG)
        d_ref[...] = jnp.zeros_like(d_ref)
        acc_ref[...] = jnp.zeros_like(acc_ref)

    ctx = ctx_ref[...]                                           # (tb, tl, H)
    masked = (mask_ref[...] > 0.5)[:, None, :]                   # (tb, 1, tl)

    # align[b, l] = sum_h qproj[b, h] * ctx[b, l, h]   -- batched, on the MXU
    s = jnp.einsum('bqh,bkh->bqk', qproj_ref[...], ctx,
                   preferred_element_type=jnp.float32)           # (tb, 1, tl)

    # --- online masked softmax over the L axis ---
    m_prev = m_ref[...]                                          # (tb, 1, 1)
    m_new = jnp.maximum(
        m_prev,
        jnp.max(jnp.where(masked, _MASK_NEG, s), axis=-1, keepdims=True))
    alpha = jnp.exp(m_prev - m_new)
    # Mask fused into the exp: masked positions contribute exactly 0.
    p = jnp.where(masked, 0.0, jnp.exp(s - m_new))               # (tb, 1, tl)
    d_ref[...] = alpha * d_ref[...] + jnp.sum(p, axis=-1, keepdims=True)

    # weighted-context partial: sum_l p[b, l] * ctx[b, l, h]  -- on the MXU
    pv = jnp.einsum('bqk,bkh->bqh', p, ctx,
                    preferred_element_type=jnp.float32)          # (tb, 1, H)
    acc_ref[...] = alpha * acc_ref[...] + pv
    m_ref[...] = m_new

    @pl.when(li == nl - 1)
    def _finalize():
        # NOTE: a fully-masked row yields d == 0 -> NaN, matching PyTorch's
        # masked_fill(-inf) + softmax behaviour.
        inv_d = pl.reciprocal(d_ref[...], approx=False)          # (tb, 1, 1)
        wctx = (acc_ref[...] * inv_d)[:, 0, :]                   # (tb, H)
        out = jnp.tanh(
            jnp.dot(wctx, wc_ref[...], preferred_element_type=jnp.float32)
            + jnp.dot(q_ref[...], wq_ref[...], preferred_element_type=jnp.float32))
        o_ref[...] = out.astype(o_ref.dtype)


@functools.partial(jax.jit, static_argnames=("block_l",))
def global_attention(query, context, mask, w_align, w_context, w_query,
                     *, block_l=512):
    """query: (B,H); context: (L,B,H); mask: (B,L) bool; weights: (H,H)."""
    B, H = query.shape
    L = context.shape[0]

    # (L, B, H) -> (B, L, H) so the in-kernel contractions have leading batch
    # dims (mirrors the proven flash-attention einsum pattern).
    # TODO(synk): accept (B, L, H) directly from the caller to avoid this extra
    # HBM pass over the context on a memory-bound kernel.
    ctx = jnp.transpose(context, (1, 0, 2))

    # nn.Linear does x @ W.T: transpose the weights ONCE here so the kernel
    # does plain x @ W with no per-invocation in-kernel transpose.
    wa_t = jnp.transpose(w_align)
    wc_t = jnp.transpose(w_context)
    wq_t = jnp.transpose(w_query)

    mask_f = mask.astype(jnp.float32)  # 1.0 == masked

    # L tile: lane-dim blocks must be a multiple of 128 or the full extent.
    if block_l % 128 == 0 and L % block_l == 0:
        tl = block_l
    elif L % 128 == 0:
        tl = 128
    else:
        tl = L
    # B tile: full batch for small B, multiples of 8 otherwise (parallel axis).
    tb = 8 if (B % 8 == 0 and B > 8) else B

    grid_spec = pltpu.PrefetchScalarGridSpec(
        num_scalar_prefetch=0,
        grid=(B // tb, L // tl),
        in_specs=[
            pl.BlockSpec((tb, H), lambda b, l: (b, 0)),          # query
            pl.BlockSpec((tb, tl, H), lambda b, l: (b, l, 0)),   # context
            pl.BlockSpec((tb, tl), lambda b, l: (b, l)),         # mask
            pl.BlockSpec((H, H), lambda b, l: (0, 0)),           # W_align^T
            pl.BlockSpec((H, H), lambda b, l: (0, 0)),           # W_context^T
            pl.BlockSpec((H, H), lambda b, l: (0, 0)),           # W_query^T
        ],
        out_specs=pl.BlockSpec((tb, H), lambda b, l: (b, 0)),
        scratch_shapes=[
            pltpu.VMEM((tb, 1, H), jnp.float32),  # projected query (resident)
            pltpu.VMEM((tb, 1, 1), jnp.float32),  # running max
            pltpu.VMEM((tb, 1, 1), jnp.float32),  # running softmax denominator
            pltpu.VMEM((tb, 1, H), jnp.float32),  # weighted-context accumulator
        ],
    )

    return pl.pallas_call(
        _global_attention_kernel,
        out_shape=jax.ShapeDtypeStruct((B, H), query.dtype),
        grid_spec=grid_spec,
        compiler_params=pltpu.CompilerParams(
            dimension_semantics=("parallel", "arbitrary"),
            vmem_limit_bytes=64 * 1024 * 1024,  # <= physical VMEM on all chips
        ),
    )(query, ctx, mask_f, wa_t, wc_t, wq_t)


def _reference(query, context, mask, w_align, w_context, w_query):
    """Pure-JAX reference mirroring the PyTorch forward exactly."""
    hp = jax.lax.Precision.HIGHEST
    ctx_t = jnp.transpose(context, (1, 0, 2))                       # (B, L, H)
    q = jnp.dot(query, w_align.T, precision=hp)                     # (B, H)
    align = jnp.einsum('blh,bh->bl', ctx_t, q, precision=hp)        # (B, L)
    align = jnp.where(mask, -jnp.inf, align)
    attn = jax.nn.softmax(align, axis=1)
    wctx = jnp.einsum('bl,blh->bh', attn, ctx_t, precision=hp)      # (B, H)
    wctx = jnp.dot(wctx, w_context.T, precision=hp)
    return jnp.tanh(wctx + jnp.dot(query, w_query.T, precision=hp))


def _bf16_round(x):
    # Make test inputs exactly bf16-representable so MXU precision choices
    # (bf16 passes vs full f32) cannot create kernel-vs-reference drift.
    return x.astype(jnp.bfloat16).astype(jnp.float32)


if __name__ == "__main__":
    B, H = 2, 32
    key = jax.random.PRNGKey(0)
    k_wa, k_wc, k_wq, k_data = jax.random.split(key, 4)

    # Deterministic parameter init (nn.Linear(H, H, bias=False) -> (H, H)).
    w_align = _bf16_round(0.1 * jax.random.normal(k_wa, (H, H), jnp.float32))
    w_context = _bf16_round(0.1 * jax.random.normal(k_wc, (H, H), jnp.float32))
    w_query = _bf16_round(0.1 * jax.random.normal(k_wq, (H, H), jnp.float32))

    for L in (256, 8):  # multi-tile online-softmax path and single-tile path
        k_q, k_c, k_m = jax.random.split(jax.random.fold_in(k_data, L), 3)
        query = _bf16_round(jax.random.normal(k_q, (B, H), jnp.float32))
        context = _bf16_round(jax.random.normal(k_c, (L, B, H), jnp.float32))

        # Length-style mask plus a few scattered masked positions
        # (no row is fully masked).
        lengths = jnp.array([L, max(1, (3 * L) // 4)], dtype=jnp.int32)
        mask = jnp.arange(L)[None, :] >= lengths[:, None]            # (B, L)
        extra = jax.random.bernoulli(k_m, 0.1, (B, L)).at[:, 0].set(False)
        mask = jnp.logical_or(mask, extra)

        out = global_attention(query, context, mask,
                               w_align, w_context, w_query)
        out = jax.block_until_ready(out)
        ref = _reference(query, context, mask, w_align, w_context, w_query)

        assert out.shape == (B, H)
        err = float(jnp.max(jnp.abs(out - ref)))
        assert jnp.allclose(out, ref, atol=2e-5, rtol=2e-5), (
            f"mismatch vs reference at L={L}: max abs err {err}")

    print("KERNEL_OK")
</pallas_src>

<mosaic_0001>
module attributes {stable_mosaic.version = 11 : i64} {
  func.func @_global_attention_kernel(%arg0: i32, %arg1: i32, %arg2: memref<2x32xf32, #tpu.memory_space<vmem>>, %arg3: memref<2x128x32xf32, #tpu.memory_space<vmem>>, %arg4: memref<2x128xf32, #tpu.memory_space<vmem>>, %arg5: memref<32x32xf32, #tpu.memory_space<vmem>>, %arg6: memref<32x32xf32, #tpu.memory_space<vmem>>, %arg7: memref<32x32xf32, #tpu.memory_space<vmem>>, %arg8: memref<2x32xf32, #tpu.memory_space<vmem>>, %arg9: memref<2x1x32xf32, #tpu.memory_space<vmem>>, %arg10: memref<2x1x1xf32, #tpu.memory_space<vmem>>, %arg11: memref<2x1x1xf32, #tpu.memory_space<vmem>>, %arg12: memref<2x1x32xf32, #tpu.memory_space<vmem>>) attributes {dimension_semantics = [#tpu.dimension_semantics<parallel>, #tpu.dimension_semantics<arbitrary>], iteration_bounds = array<i64: 1, 2>, scalar_prefetch = 0 : i64, scratch_operands = 4 : i64, tpu.core_type = #tpu.core_type<tc>, window_params = [{transform_indices = @transform_0, window_bounds = array<i64: 2, 32>}, {transform_indices = @transform_1, window_bounds = array<i64: 2, 128, 32>}, {transform_indices = @transform_2, window_bounds = array<i64: 2, 128>}, {pipeline_mode = #tpu.pipeline_mode<synchronous>, transform_indices = @transform_3, window_bounds = array<i64: 32, 32>}, {pipeline_mode = #tpu.pipeline_mode<synchronous>, transform_indices = @transform_4, window_bounds = array<i64: 32, 32>}, {pipeline_mode = #tpu.pipeline_mode<synchronous>, transform_indices = @transform_5, window_bounds = array<i64: 32, 32>}, {transform_indices = @transform_6, window_bounds = array<i64: 2, 32>}]} {
    %c0_i32 = arith.constant 0 : i32
    %0 = arith.cmpi eq, %arg1, %c0_i32 : i32
    %1 = arith.extui %0 : i1 to i32
    %c0_i32_0 = arith.constant 0 : i32
    %2 = arith.cmpi ne, %1, %c0_i32_0 : i32
    scf.if %2 {
      %c0_33 = arith.constant 0 : index
      %c0_34 = arith.constant 0 : index
      %39 = vector.load %arg2[%c0_33, %c0_34] : memref<2x32xf32, #tpu.memory_space<vmem>>, vector<2x32xf32>
      %c0_35 = arith.constant 0 : index
      %c0_36 = arith.constant 0 : index
      %40 = vector.load %arg5[%c0_35, %c0_36] : memref<32x32xf32, #tpu.memory_space<vmem>>, vector<32x32xf32>
      %cst_37 = arith.constant dense<0.000000e+00> : vector<2x32xf32>
      %41 = tpu.matmul %39, %40, %cst_37 {dimension_numbers = #tpu.dot_dimension_numbers<[1], [0], [0], [1], [0, 0, 1, 1], [], []>} : vector<2x32xf32>, vector<32x32xf32>, vector<2x32xf32> -> vector<2x32xf32>
      %42 = vector.shape_cast %41 : vector<2x32xf32> to vector<2x1x32xf32>
      %c0_38 = arith.constant 0 : index
      %c0_39 = arith.constant 0 : index
      %c0_40 = arith.constant 0 : index
      %43 = vector.load %arg9[%c0_38, %c0_39, %c0_40] : memref<2x1x32xf32, #tpu.memory_space<vmem>>, vector<2x1x32xf32>
      tpu.vector_store %arg9[%c0_38, %c0_39, %c0_40], %42 {strides = array<i32>} : memref<2x1x32xf32, #tpu.memory_space<vmem>>, vector<2x1x32xf32>,
      %cst_41 = arith.constant -1.000000e+30 : f32
      %44 = vector.broadcast %cst_41 : f32 to vector<2x1x1xf32>
      %c0_42 = arith.constant 0 : index
      %c0_43 = arith.constant 0 : index
      %c0_44 = arith.constant 0 : index
      %45 = vector.load %arg10[%c0_42, %c0_43, %c0_44] : memref<2x1x1xf32, #tpu.memory_space<vmem>>, vector<2x1x1xf32>
      tpu.vector_store %arg10[%c0_42, %c0_43, %c0_44], %44 {strides = array<i32>} : memref<2x1x1xf32, #tpu.memory_space<vmem>>, vector<2x1x1xf32>,
      %cst_45 = arith.constant 0.000000e+00 : f32
      %46 = vector.broadcast %cst_45 : f32 to vector<2x1x1xf32>
      %c0_46 = arith.constant 0 : index
      %c0_47 = arith.constant 0 : index
      %c0_48 = arith.constant 0 : index
      %47 = vector.load %arg11[%c0_46, %c0_47, %c0_48] : memref<2x1x1xf32, #tpu.memory_space<vmem>>, vector<2x1x1xf32>
      tpu.vector_store %arg11[%c0_46, %c0_47, %c0_48], %46 {strides = array<i32>} : memref<2x1x1xf32, #tpu.memory_space<vmem>>, vector<2x1x1xf32>,
      %cst_49 = arith.constant 0.000000e+00 : f32
      %48 = vector.broadcast %cst_49 : f32 to vector<2x1x32xf32>
      %c0_50 = arith.constant 0 : index
      %c0_51 = arith.constant 0 : index
      %c0_52 = arith.constant 0 : index
      %49 = vector.load %arg12[%c0_50, %c0_51, %c0_52] : memref<2x1x32xf32, #tpu.memory_space<vmem>>, vector<2x1x32xf32>
      tpu.vector_store %arg12[%c0_50, %c0_51, %c0_52], %48 {strides = array<i32>} : memref<2x1x32xf32, #tpu.memory_space<vmem>>, vector<2x1x32xf32>,
    } else {
    }
    %c0 = arith.constant 0 : index
    %c0_1 = arith.constant 0 : index
    %c0_2 = arith.constant 0 : index
    %3 = vector.load %arg3[%c0, %c0_1, %c0_2] : memref<2x128x32xf32, #tpu.memory_space<vmem>>, vector<2x128x32xf32>
    %c0_3 = arith.constant 0 : index
    %c0_4 = arith.constant 0 : index
    %4 = vector.load %arg4[%c0_3, %c0_4] : memref<2x128xf32, #tpu.memory_space<vmem>>, vector<2x128xf32>
    %cst = arith.constant 5.000000e-01 : f32
    %5 = vector.broadcast %cst : f32 to vector<2x128xf32>
    %6 = arith.cmpf ogt, %4, %5 : vector<2x128xf32>
    %7 = vector.shape_cast %6 : vector<2x128xi1> to vector<2x1x128xi1>
    %c0_5 = arith.constant 0 : index
    %c0_6 = arith.constant 0 : index
    %c0_7 = arith.constant 0 : index
    %8 = vector.load %arg9[%c0_5, %c0_6, %c0_7] : memref<2x1x32xf32, #tpu.memory_space<vmem>>, vector<2x1x32xf32>
    "tpu.trace_start"() <{level = 10 : i32, message = "bqh,bkh->bqk"}> : () -> ()
    %cst_8 = arith.constant dense<0.000000e+00> : vector<2x1x128xf32>
    %9 = tpu.matmul %8, %3, %cst_8 {dimension_numbers = #tpu.dot_dimension_numbers<[2], [2], [1], [1], [0, 0, 0, 1, 1, 1], [0], [0]>} : vector<2x1x32xf32>, vector<2x128x32xf32>, vector<2x1x128xf32> -> vector<2x1x128xf32>
    "tpu.trace_stop"() : () -> ()
    %c0_9 = arith.constant 0 : index
    %c0_10 = arith.constant 0 : index
    %c0_11 = arith.constant 0 : index
    %10 = vector.load %arg10[%c0_9, %c0_10, %c0_11] : memref<2x1x1xf32, #tpu.memory_space<vmem>>, vector<2x1x1xf32>
    %cst_12 = arith.constant -1.000000e+30 : f32
    %11 = vector.broadcast %cst_12 : f32 to vector<2x1x128xf32>
    %12 = arith.select %7, %11, %9 : vector<2x1x128xi1>, vector<2x1x128xf32>
    %cst_13 = arith.constant dense<0xFF800000> : vector<2x1xf32>
    %13 = vector.multi_reduction <maximumf>, %12, %cst_13 [2] : vector<2x1x128xf32> to vector<2x1xf32>
    %14 = vector.shape_cast %13 : vector<2x1xf32> to vector<2x1x1xf32>
    %15 = arith.maximumf %10, %14 : vector<2x1x1xf32>
    %16 = arith.subf %10, %15 : vector<2x1x1xf32>
    %17 = math.exp %16 : vector<2x1x1xf32>
    %18 = vector.broadcast %15 : vector<2x1x1xf32> to vector<2x1x128xf32>
    %19 = arith.subf %9, %18 : vector<2x1x128xf32>
    %20 = math.exp %19 : vector<2x1x128xf32>
    %cst_14 = arith.constant 0.000000e+00 : f32
    %21 = vector.broadcast %cst_14 : f32 to vector<2x1x128xf32>
    %22 = arith.select %7, %21, %20 : vector<2x1x128xi1>, vector<2x1x128xf32>
    %c0_15 = arith.constant 0 : index
    %c0_16 = arith.constant 0 : index
    %c0_17 = arith.constant 0 : index
    %23 = vector.load %arg11[%c0_15, %c0_16, %c0_17] : memref<2x1x1xf32, #tpu.memory_space<vmem>>, vector<2x1x1xf32>
    %24 = arith.mulf %17, %23 : vector<2x1x1xf32>
    %cst_18 = arith.constant dense<0.000000e+00> : vector<2x1xf32>
    %25 = vector.multi_reduction <add>, %22, %cst_18 [2] : vector<2x1x128xf32> to vector<2x1xf32>
    %26 = vector.shape_cast %25 : vector<2x1xf32> to vector<2x1x1xf32>
    %27 = arith.addf %24, %26 : vector<2x1x1xf32>
    %c0_19 = arith.constant 0 : index
    %c0_20 = arith.constant 0 : index
    %c0_21 = arith.constant 0 : index
    %28 = vector.load %arg11[%c0_19, %c0_20, %c0_21] : memref<2x1x1xf32, #tpu.memory_space<vmem>>, vector<2x1x1xf32>
    tpu.vector_store %arg11[%c0_19, %c0_20, %c0_21], %27 {strides = array<i32>} : memref<2x1x1xf32, #tpu.memory_space<vmem>>, vector<2x1x1xf32>,
    "tpu.trace_start"() <{level = 10 : i32, message = "bqk,bkh->bqh"}> : () -> ()
    %cst_22 = arith.constant dense<0.000000e+00> : vector<2x1x32xf32>
    %29 = tpu.matmul %22, %3, %cst_22 {dimension_numbers = #tpu.dot_dimension_numbers<[2], [1], [1], [2], [0, 0, 0, 1, 1, 2], [0], [0]>} : vector<2x1x128xf32>, vector<2x128x32xf32>, vector<2x1x32xf32> -> vector<2x1x32xf32>
    "tpu.trace_stop"() : () -> ()
    %c0_23 = arith.constant 0 : index
    %c0_24 = arith.constant 0 : index
    %c0_25 = arith.constant 0 : index
    %30 = vector.load %arg12[%c0_23, %c0_24, %c0_25] : memref<2x1x32xf32, #tpu.memory_space<vmem>>, vector<2x1x32xf32>
    %31 = vector.broadcast %17 : vector<2x1x1xf32> to vector<2x1x32xf32>
    %32 = arith.mulf %31, %30 : vector<2x1x32xf32>
    %33 = arith.addf %32, %29 : vector<2x1x32xf32>
    %c0_26 = arith.constant 0 : index
    %c0_27 = arith.constant 0 : index
    %c0_28 = arith.constant 0 : index
    %34 = vector.load %arg12[%c0_26, %c0_27, %c0_28] : memref<2x1x32xf32, #tpu.memory_space<vmem>>, vector<2x1x32xf32>
    tpu.vector_store %arg12[%c0_26, %c0_27, %c0_28], %33 {strides = array<i32>} : memref<2x1x32xf32, #tpu.memory_space<vmem>>, vector<2x1x32xf32>,
    %c0_29 = arith.constant 0 : index
    %c0_30 = arith.constant 0 : index
    %c0_31 = arith.constant 0 : index
    %35 = vector.load %arg10[%c0_29, %c0_30, %c0_31] : memref<2x1x1xf32, #tpu.memory_space<vmem>>, vector<2x1x1xf32>
    tpu.vector_store %arg10[%c0_29, %c0_30, %c0_31], %15 {strides = array<i32>} : memref<2x1x1xf32, #tpu.memory_space<vmem>>, vector<2x1x1xf32>,
    %c1_i32 = arith.constant 1 : i32
    %36 = arith.cmpi eq, %arg1, %c1_i32 : i32
    %37 = arith.extui %36 : i1 to i32
    %c0_i32_32 = arith.constant 0 : i32
    %38 = arith.cmpi ne, %37, %c0_i32_32 : i32
    scf.if %38 {
      %c0_33 = arith.constant 0 : index
      %c0_34 = arith.constant 0 : index
      %c0_35 = arith.constant 0 : index
      %39 = vector.load %arg11[%c0_33, %c0_34, %c0_35] : memref<2x1x1xf32, #tpu.memory_space<vmem>>, vector<2x1x1xf32>
      %40 = tpu.reciprocal %39 : vector<2x1x1xf32> -> vector<2x1x1xf32>
      %c0_36 = arith.constant 0 : index
      %c0_37 = arith.constant 0 : index
      %c0_38 = arith.constant 0 : index
      %41 = vector.load %arg12[%c0_36, %c0_37, %c0_38] : memref<2x1x32xf32, #tpu.memory_space<vmem>>, vector<2x1x32xf32>
      %42 = vector.broadcast %40 : vector<2x1x1xf32> to vector<2x1x32xf32>
      %43 = arith.mulf %41, %42 : vector<2x1x32xf32>
      %44 = vector.shape_cast %43 : vector<2x1x32xf32> to vector<2x32xf32>
      %c0_39 = arith.constant 0 : index
      %c0_40 = arith.constant 0 : index
      %45 = vector.load %arg6[%c0_39, %c0_40] : memref<32x32xf32, #tpu.memory_space<vmem>>, vector<32x32xf32>
      %cst_41 = arith.constant dense<0.000000e+00> : vector<2x32xf32>
      %46 = tpu.matmul %44, %45, %cst_41 {dimension_numbers = #tpu.dot_dimension_numbers<[1], [0], [0], [1], [0, 0, 1, 1], [], []>} : vector<2x32xf32>, vector<32x32xf32>, vector<2x32xf32> -> vector<2x32xf32>
      %c0_42 = arith.constant 0 : index
      %c0_43 = arith.constant 0 : index
      %47 = vector.load %arg2[%c0_42, %c0_43] : memref<2x32xf32, #tpu.memory_space<vmem>>, vector<2x32xf32>
      %c0_44 = arith.constant 0 : index
      %c0_45 = arith.constant 0 : index
      %48 = vector.load %arg7[%c0_44, %c0_45] : memref<32x32xf32, #tpu.memory_space<vmem>>, vector<32x32xf32>
      %cst_46 = arith.constant dense<0.000000e+00> : vector<2x32xf32>
      %49 = tpu.matmul %47, %48, %cst_46 {dimension_numbers = #tpu.dot_dimension_numbers<[1], [0], [0], [1], [0, 0, 1, 1], [], []>} : vector<2x32xf32>, vector<32x32xf32>, vector<2x32xf32> -> vector<2x32xf32>
      %50 = arith.addf %46, %49 : vector<2x32xf32>
      %51 = math.tanh %50 : vector<2x32xf32>
      %c0_47 = arith.constant 0 : index
      %c0_48 = arith.constant 0 : index
      %52 = vector.load %arg8[%c0_47, %c0_48] : memref<2x32xf32, #tpu.memory_space<vmem>>, vector<2x32xf32>
      tpu.vector_store %arg8[%c0_47, %c0_48], %51 {strides = array<i32>} : memref<2x32xf32, #tpu.memory_space<vmem>>, vector<2x32xf32>,
    } else {
    }
    return
  }
  func.func @transform_0(%arg0: i32, %arg1: i32) -> (i32, i32) {
    %c0_i32 = arith.constant 0 : i32
    %c0_i32_0 = arith.constant 0 : i32
    return %arg0, %c0_i32 : i32, i32
  }
  func.func @transform_1(%arg0: i32, %arg1: i32) -> (i32, i32, i32) {
    %c0_i32 = arith.constant 0 : i32
    %c0_i32_0 = arith.constant 0 : i32
    return %arg0, %arg1, %c0_i32 : i32, i32, i32
  }
  func.func @transform_2(%arg0: i32, %arg1: i32) -> (i32, i32) {
    %c0_i32 = arith.constant 0 : i32
    return %arg0, %arg1 : i32, i32
  }
  func.func @transform_3(%arg0: i32, %arg1: i32) -> (i32, i32) {
    %c0_i32 = arith.constant 0 : i32
    %c0_i32_0 = arith.constant 0 : i32
    %c0_i32_1 = arith.constant 0 : i32
    return %c0_i32, %c0_i32_0 : i32, i32
  }
  func.func @transform_4(%arg0: i32, %arg1: i32) -> (i32, i32) {
    %c0_i32 = arith.constant 0 : i32
    %c0_i32_0 = arith.constant 0 : i32
    %c0_i32_1 = arith.constant 0 : i32
    return %c0_i32, %c0_i32_0 : i32, i32
  }
  func.func @transform_5(%arg0: i32, %arg1: i32) -> (i32, i32) {
    %c0_i32 = arith.constant 0 : i32
    %c0_i32_0 = arith.constant 0 : i32
    %c0_i32_1 = arith.constant 0 : i32
    return %c0_i32, %c0_i32_0 : i32, i32
  }
  func.func @transform_6(%arg0: i32, %arg1: i32) -> (i32, i32) {
    %c0_i32 = arith.constant 0 : i32
    %c0_i32_0 = arith.constant 0 : i32
    return %arg0, %c0_i32 : i32, i32
  }
}

</mosaic_0001>

<bundles_post_ra>
// kernel: global_attention.1
= control target key start
LH: loop header
LB: loop body
LE: loop exit
PB: predicated region body
PF: predicated region fallthrough
CT: control target
= control target key end

     0   :  { %11 = vsyncpa [#allocation8], 0  ;;  %s1270_s21 = smov 0   ;;  %s1272_s22 = smov 0   ;;  %s1549_s0 = inlined_call_operand.vmem [shape: f32[2,32], index: 0, kind: input, shape index: {}]   ;;  %s1550_s1 = inlined_call_operand.vmem [shape: f32[2,256,32], index: 1, kind: input, shape index: {}]   ;;  %s1551_s2 = inlined_call_operand.vmem [shape: f32[2,256], index: 2, kind: input, shape index: {}]   ;;  %s1552_s3 = inlined_call_operand.vmem [shape: f32[32,32], index: 3, kind: input, shape index: {}]   ;;  %s1553_s4 = inlined_call_operand.vmem [shape: f32[32,32], index: 4, kind: input, shape index: {}]   ;;  %s1554_s5 = inlined_call_operand.vmem [shape: f32[32,32], index: 5, kind: input, shape index: {}]   ;;  %s1555_s6 = inlined_call_operand.hbm [shape: f32[2,32], index: 6, kind: output, shape index: {}]  }
   0x1   :  { %s1274_s23 = smov 0   ;;  %s1276_s24 = smov 0  }
   0x2   :  { %s1278_s25 = smov 0  }
   0x3 LB: > { %s1031_s26 = sadd.s32 4294967295, %s1228_s25   ;;  %s26_s27 = sadd.s32 1, %s1224_s24  ;;  %s1228_s25 = sphi %s1278_s25, %s17_s25   ;;  %s1224_s24 = sphi %s1276_s24, %s1561_s24   ;;  %s1220_s23 = sphi %s1274_s23, %s1560_s23   ;;  %s1216_s22 = sphi %s1272_s22, %s1559_s22   ;;  %s1212_s21 = sphi %s1270_s21, %s1558_s21  }
   0x4   : > { %p27_p0 = scmp.ge.s32.totalorder %s26_s27, 2  ;;  %p71_p1 = scmp.ne.s32.totalorder %s1216_s22, %s1212_s21 }
   0x5   : > { %p72_p2 = scmp.eq.s32.totalorder %s1228_s25, 0  ;;  %s64_s29 = sadd.s32 1, %s1216_s22 }
   0x6   : > { %s1563_s27 = smov (%p27_p0, %s26_s27), 0  ;;  %p1034_p5 = scmp.ge.s32.totalorder %s1228_s25, 2 }
   0x7   : > { %p73_p3 = por %p72_p2, %p71_p1  ;;  %s60_s28 = ssub.s32 %s1224_s24, %s1563_s27 }
   0x8   : > { %p62_p4 = scmp.eq.s32.totalorder %s60_s28, 0  ;;  %230 = sbr.rel (%p1034_p5) target bundleno = 49 (0x31), region = 32 }
   0xa   : > { %s1306_s30 = scalar_select %p62_p4, %s1216_s22, %s64_s29  }
   0xd   : > { %233 = sbr.rel (!%p73_p3) target bundleno = 49 (0x31), region = 36  ;;  %s235_s7 = sand.u32 (%p73_p3), 1, %s1216_s22  }
   0xe   : > { %s1088_s8 = sshll.u32 (%p73_p3), %s1224_s24, 7  ;;  %s1035_s9 = sshll.u32 (%p73_p3), %s235_s7, 8 }
   0xf   : > { %s1314_s12 = scalar_lea.vmem (%p73_p3), %s1550_s1, %s1088_s8  ;;  %s1319_s13 = scalar_lea.vmem (%p73_p3), [#allocation6], %s1035_s9 }
  0x10   : > { %v334_v0 = vld [vmem:[%s1314_s12] sm:$0xff] (%p73_p3)  ;;  %v336_v1 = vld [vmem:[%s1314_s12 + $0x8] sm:$0xff] (%p73_p3)  ;;  %v338_v2 = vld [vmem:[%s1314_s12 + $0x10] sm:$0xff] (%p73_p3) }
  0x11   : > { %335 = vst [vmem:[%s1319_s13] sm:$0xff] (%p73_p3), %v334_v0  ;;  %v340_v3 = vld [vmem:[%s1314_s12 + $0x18] sm:$0xff] (%p73_p3)  ;;  %v342_v4 = vld [vmem:[%s1314_s12 + $0x20] sm:$0xff] (%p73_p3)  ;;  %v344_v5 = vld [vmem:[%s1314_s12 + $0x28] sm:$0xff] (%p73_p3) }
  0x12   : > { %337 = vst [vmem:[%s1319_s13 + $0x8] sm:$0xff] %v336_v1  ;;  %v346_v6 = vld [vmem:[%s1314_s12 + $0x30] sm:$0xff]  ;;  %v348_v7 = vld [vmem:[%s1314_s12 + $0x38] sm:$0xff]  ;;  %v350_v8 = vld [vmem:[%s1314_s12 + $0x40] sm:$0xff] }
  0x13   : > { %339 = vst [vmem:[%s1319_s13 + $0x10] sm:$0xff] %v338_v2  ;;  %v352_v9 = vld [vmem:[%s1314_s12 + $0x48] sm:$0xff]  ;;  %v354_v10 = vld [vmem:[%s1314_s12 + $0x50] sm:$0xff]  ;;  %v356_v11 = vld [vmem:[%s1314_s12 + $0x58] sm:$0xff] }
  0x14   : > { %341 = vst [vmem:[%s1319_s13 + $0x18] sm:$0xff] %v340_v3  ;;  %v358_v12 = vld [vmem:[%s1314_s12 + $0x60] sm:$0xff]  ;;  %v360_v13 = vld [vmem:[%s1314_s12 + $0x68] sm:$0xff]  ;;  %v362_v14 = vld [vmem:[%s1314_s12 + $0x70] sm:$0xff] }
  0x15   : > { %343 = vst [vmem:[%s1319_s13 + $0x20] sm:$0xff] %v342_v4  ;;  %v364_v15 = vld [vmem:[%s1314_s12 + $0x78] sm:$0xff]  ;;  %v366_v16 = vld [vmem:[%s1314_s12 + $0x100] sm:$0xff]  ;;  %v368_v17 = vld [vmem:[%s1314_s12 + $0x108] sm:$0xff] }
  0x16   : > { %345 = vst [vmem:[%s1319_s13 + $0x28] sm:$0xff] %v344_v5  ;;  %v370_v18 = vld [vmem:[%s1314_s12 + $0x110] sm:$0xff]  ;;  %v372_v19 = vld [vmem:[%s1314_s12 + $0x118] sm:$0xff]  ;;  %v374_v20 = vld [vmem:[%s1314_s12 + $0x120] sm:$0xff] }
  0x17   : > { %347 = vst [vmem:[%s1319_s13 + $0x30] sm:$0xff] %v346_v6  ;;  %v376_v21 = vld [vmem:[%s1314_s12 + $0x128] sm:$0xff]  ;;  %v378_v22 = vld [vmem:[%s1314_s12 + $0x130] sm:$0xff]  ;;  %v380_v23 = vld [vmem:[%s1314_s12 + $0x138] sm:$0xff] }
  0x18   : > { %349 = vst [vmem:[%s1319_s13 + $0x38] sm:$0xff] %v348_v7  ;;  %v382_v24 = vld [vmem:[%s1314_s12 + $0x140] sm:$0xff]  ;;  %v384_v25 = vld [vmem:[%s1314_s12 + $0x148] sm:$0xff]  ;;  %v386_v26 = vld [vmem:[%s1314_s12 + $0x150] sm:$0xff] }
  0x19   : > { %351 = vst [vmem:[%s1319_s13 + $0x40] sm:$0xff] %v350_v8  ;;  %v388_v27 = vld [vmem:[%s1314_s12 + $0x158] sm:$0xff]  ;;  %v390_v28 = vld [vmem:[%s1314_s12 + $0x160] sm:$0xff]  ;;  %v392_v29 = vld [vmem:[%s1314_s12 + $0x168] sm:$0xff] }
  0x1a   : > { %353 = vst [vmem:[%s1319_s13 + $0x48] sm:$0xff] %v352_v9  ;;  %v394_v30 = vld [vmem:[%s1314_s12 + $0x170] sm:$0xff]  ;;  %v396_v31 = vld [vmem:[%s1314_s12 + $0x178] sm:$0xff] }
  0x1b   : > { %355 = vst [vmem:[%s1319_s13 + $0x50] sm:$0xff] %v354_v10 }
  0x1c   : > { %357 = vst [vmem:[%s1319_s13 + $0x58] sm:$0xff] %v356_v11 }
  0x1d   : > { %359 = vst [vmem:[%s1319_s13 + $0x60] sm:$0xff] %v358_v12 }
  0x1e   : > { %361 = vst [vmem:[%s1319_s13 + $0x68] sm:$0xff] %v360_v13 }
  0x1f   : > { %363 = vst [vmem:[%s1319_s13 + $0x70] sm:$0xff] %v362_v14 }
  0x20   : > { %365 = vst [vmem:[%s1319_s13 + $0x78] sm:$0xff] %v364_v15 }
  0x21   : > { %367 = vst [vmem:[%s1319_s13 + $0x80] sm:$0xff] %v366_v16 }
  0x22   : > { %369 = vst [vmem:[%s1319_s13 + $0x88] sm:$0xff] %v368_v17 }
  0x23   : > { %371 = vst [vmem:[%s1319_s13 + $0x90] sm:$0xff] %v370_v18 }
  0x24   : > { %373 = vst [vmem:[%s1319_s13 + $0x98] sm:$0xff] %v372_v19 }
  0x25   : > { %375 = vst [vmem:[%s1319_s13 + $0xa0] sm:$0xff] %v374_v20 }
  0x26   : > { %377 = vst [vmem:[%s1319_s13 + $0xa8] sm:$0xff] %v376_v21 }
  0x27   : > { %379 = vst [vmem:[%s1319_s13 + $0xb0] sm:$0xff] %v378_v22 }
  0x28   : > { %381 = vst [vmem:[%s1319_s13 + $0xb8] sm:$0xff] %v380_v23 }
  0x29   : > { %383 = vst [vmem:[%s1319_s13 + $0xc0] sm:$0xff] %v382_v24 }
  0x2a   : > { %385 = vst [vmem:[%s1319_s13 + $0xc8] sm:$0xff] %v384_v25 }
  0x2b   : > { %387 = vst [vmem:[%s1319_s13 + $0xd0] sm:$0xff] %v386_v26 }
  0x2c   : > { %389 = vst [vmem:[%s1319_s13 + $0xd8] sm:$0xff] %v388_v27 }
  0x2d   : > { %391 = vst [vmem:[%s1319_s13 + $0xe0] sm:$0xff] %v390_v28 }
  0x2e   : > { %393 = vst [vmem:[%s1319_s13 + $0xe8] sm:$0xff] %v392_v29 }
  0x2f   : > { %395 = vst [vmem:[%s1319_s13 + $0xf0] sm:$0xff] %v394_v30 }
  0x30   : > { %397 = vst [vmem:[%s1319_s13 + $0xf8] sm:$0xff] %v396_v31 }
  0x31 PF: > { %p1038_p6 = scmp.ge.s32.totalorder %s1228_s25, 1  ;;  %p413_p7 = scmp.lt.s32.totalorder %s1228_s25, 3 }
  0x33   : > { %p414_p8 = pnand %p1038_p6, %p413_p7 }
  0x34   : > { %s420_s14 = sand.u32 (!%p414_p8), 1, %s1212_s21   ;;  %p464_p9 = scmp.lt.s32.totalorder (!%p414_p8), %s1220_s23, 1 }
  0x35   : > { %417 = sbr.rel (%p414_p8) target bundleno = 1077 (0x435), region = 78  ;;  %s1039_s15 = sshll.u32 (!%p414_p8), %s420_s14, 8 }
  0x36   : > { %s1392_s28 = scalar_lea.vmem (!%p414_p8), [#allocation6], %s1039_s15  ;;  %p1041_p10 = scmp.ne.s32.totalorder (!%p414_p8), %s1220_s23, 0 }
  0x3a   : > { %s465_s16 = scalar_select %p464_p9, %s1220_s23, 1 }
  0x3b   : > { %473 = sbr.rel (%p1041_p10) target bundleno = 201 (0xc9), region = 86 }
  0x3c   : > { %s1040_s17 = sshll.u32 %s465_s16, 1 }
  0x3d   : > { %s1390_s20 = scalar_lea.vmem %s1551_s2, %s1040_s17 }
  0x40   : > { %v478_v32 = vld [vmem:[%s1552_s3 + $0x18] sm:$0xff]  ;;  %v477_v33 = vld [vmem:[%s1552_s3 + $0x10] sm:$0xff]  ;;  %v476_v34 = vld [vmem:[%s1552_s3 + $0x8] sm:$0xff]  ;;  %vm479_vm0 = vcmask 261120   ;;  %vm509_vm1 = vcmask 0   ;;  %v1231_v38 = vmov 0.0  }
  0x41   : > { %495 = vmatpush.msra.mxu0 %v478_v32  ;;  %v475_v35 = vld [vmem:[%s1552_s3] sm:$0xff]  ;;  %v1230_v37 = vmov -1e+30   ;;  %512 = vst.msk [vmem:[#allocation4] sm:$0x1] %vm509_vm1, %v1231_v38  ;;  %vm506_vm2 = vcmask 253952  }
  0x42   : > { %v474_v36 = vld [vmem:[%s1549_s0] sm:$0x3]  ;;  %510 = vst.msk [vmem:[#allocation3] sm:$0x1] %vm509_vm1, %v1230_v37 }
  0x43   : > { %496 = vmatpush.msra.mxu0 %v477_v33  ;;  %511 = vst.msk [vmem:[#allocation3 + $0x1] sm:$0x1] %vm509_vm1, %v1230_v37 }
  0x44   : > { %513 = vst.msk [vmem:[#allocation4 + $0x1] sm:$0x1] %vm509_vm1, %v1231_v38 }
  0x45   : > { %497 = vmatpush.msra.mxu0 %v476_v34  ;;  %514 = vst.msk [vmem:[#allocation5] sm:$0x1] %vm506_vm2, %v1231_v38 }
  0x46   : > { %515 = vst.msk [vmem:[#allocation5 + $0x1] sm:$0x1] %vm506_vm2, %v1231_v38 }
  0x47   : > { %498 = vmatpush.msra.mxu0 %v475_v35 }
  0x48   : > { %1042 = vmatmul.msk.f32.vlgmr.msra.gmra.mxu0 %vm479_vm0, %v474_v36 }
  0xc5   : > { %v500_v39 = vpop.f32.mrf.mxu0 }
  0xc6   : > { %v504_v40 = vrot.slane %v500_v39, 1  ;;  %507 = vst.msk [vmem:[#allocation2] sm:$0x1] %vm506_vm2, %v500_v39 }
  0xc8   : > { %508 = vst.msk [vmem:[#allocation2 + $0x1] sm:$0x1] %vm506_vm2, %v504_v40 }
  0xc9 PF: > { %v531_v41 = vld [vmem:[%s1392_s28 + $0x78] sm:$0xff]  ;;  %vm555_vm3 = vcmask 261120   ;;  %v530_v43 = vld [vmem:[%s1392_s28 + $0x70] sm:$0xff]  ;;  %v529_v45 = vld [vmem:[%s1392_s28 + $0x68] sm:$0xff]  ;;  %v1232_v11 = vmov 0   ;;  %vm702_vm5 = vcmask 1040384  }
  0xca   : > { %1043 = vmatpush.xpose.msk.msra.mxu0 %vm555_vm3, %v531_v41  ;;  %v547_v42 = vld [vmem:[%s1392_s28 + $0xf8] sm:$0xff]  ;;  %752 = vmatpush.msra.mxu2 %v531_v41  ;;  %v546_v44 = vld [vmem:[%s1392_s28 + $0xf0] sm:$0xff]  ;;  %v545_v46 = vld [vmem:[%s1392_s28 + $0xe8] sm:$0xff]  ;;  %vm749_vm7 = vcmask 0   ;;  %vm810_vm10 = vcmask 253952   ;;  %p1081_p11 = scmp.ne.s32.totalorder %s1220_s23, 1 }
  0xcb   : > { %1060 = vmatpush.xpose.msk.msra.mxu1 %vm555_vm3, %v547_v42  ;;  %772 = vmatpush.msra.mxu3 %v547_v42  ;;  %v528_v47 = vld [vmem:[%s1392_s28 + $0x60] sm:$0xff]  ;;  %v527_v49 = vld [vmem:[%s1392_s28 + $0x58] sm:$0xff]  ;;  %v526_v51 = vld [vmem:[%s1392_s28 + $0x50] sm:$0xff] }
  0xcc   : > { %753 = vmatpush.msra.mxu2 %v530_v43  ;;  %v544_v48 = vld [vmem:[%s1392_s28 + $0xe0] sm:$0xff]  ;;  %v543_v50 = vld [vmem:[%s1392_s28 + $0xd8] sm:$0xff]  ;;  %v542_v52 = vld [vmem:[%s1392_s28 + $0xd0] sm:$0xff]  ;;  %1140 = vset.pattern.permute.xlu1 %v1232_v11 }
  0xcd   : > { %773 = vmatpush.msra.mxu3 %v546_v44  ;;  %v525_v53 = vld [vmem:[%s1392_s28 + $0x48] sm:$0xff]  ;;  %v524_v55 = vld [vmem:[%s1392_s28 + $0x40] sm:$0xff]  ;;  %v523_v57 = vld [vmem:[%s1392_s28 + $0x38] sm:$0xff]  ;;  %1141 = vset.pattern.permute.xlu2 %v1232_v11 }
  0xce   : > { %1044 = vmatpush.xpose.msk.msra.mxu0 %vm555_vm3, %v530_v43  ;;  %754 = vmatpush.msra.mxu2 %v529_v45  ;;  %v541_v54 = vld [vmem:[%s1392_s28 + $0xc8] sm:$0xff]  ;;  %v540_v56 = vld [vmem:[%s1392_s28 + $0xc0] sm:$0xff]  ;;  %v539_v58 = vld [vmem:[%s1392_s28 + $0xb8] sm:$0xff] }
  0xcf   : > { %1061 = vmatpush.xpose.msk.msra.mxu1 %vm555_vm3, %v546_v44  ;;  %774 = vmatpush.msra.mxu3 %v545_v46  ;;  %v522_v59 = vld [vmem:[%s1392_s28 + $0x30] sm:$0xff]  ;;  %v521_v61 = vld [vmem:[%s1392_s28 + $0x28] sm:$0xff]  ;;  %v520_v63 = vld [vmem:[%s1392_s28 + $0x20] sm:$0xff] }
  0xd0   : > { %755 = vmatpush.msra.mxu2 %v528_v47  ;;  %v538_v60 = vld [vmem:[%s1392_s28 + $0xb0] sm:$0xff]  ;;  %v537_v62 = vld [vmem:[%s1392_s28 + $0xa8] sm:$0xff]  ;;  %v536_v0 = vld [vmem:[%s1392_s28 + $0xa0] sm:$0xff]  ;;  %1142 = vset.pattern.permute.xlu0 %v1232_v11 }
  0xd1   : > { %775 = vmatpush.msra.mxu3 %v544_v48  ;;  %v519_v1 = vld [vmem:[%s1392_s28 + $0x18] sm:$0xff]  ;;  %v518_v3 = vld [vmem:[%s1392_s28 + $0x10] sm:$0xff]  ;;  %v517_v4 = vld [vmem:[%s1392_s28 + $0x8] sm:$0xff] }
  0xd2   : > { %1045 = vmatpush.xpose.msk.msra.mxu0 %vm555_vm3, %v529_v45  ;;  %756 = vmatpush.msra.mxu2 %v527_v49  ;;  %v535_v2 = vld [vmem:[%s1392_s28 + $0x98] sm:$0xff]  ;;  %v534_v5 = vld [vmem:[%s1392_s28 + $0x90] sm:$0xff]  ;;  %v516_v6 = vld [vmem:[%s1392_s28] sm:$0xff] }
  0xd3   : > { %1062 = vmatpush.xpose.msk.msra.mxu1 %vm555_vm3, %v545_v46  ;;  %776 = vmatpush.msra.mxu3 %v543_v50  ;;  %v533_v7 = vld [vmem:[%s1392_s28 + $0x88] sm:$0xff]  ;;  %v532_v8 = vld [vmem:[%s1392_s28 + $0x80] sm:$0xff]  ;;  %v553_v9 = vld [vmem:[#allocation2] sm:$0x1] }
  0xd4   : > { %757 = vmatpush.msra.mxu2 %v526_v51  ;;  %v554_v10 = vld [vmem:[#allocation2 + $0x1] sm:$0x1]  ;;  %v548_v12 = vld [vmem:[%s1390_s20] sm:$0x3]  ;;  %v698_v22 = vld [vmem:[#allocation3] sm:$0x1] }
  0xd5   : > { %777 = vmatpush.msra.mxu3 %v542_v52  ;;  %vm549_vm4 = vcmp.gt.f32.partialorder %v548_v12, 0.5  ;;  %v699_v27 = vld [vmem:[#allocation3 + $0x1] sm:$0x1] }
  0xd6   : > { %1046 = vmatpush.xpose.msk.msra.mxu0 %vm555_vm3, %v528_v47  ;;  %758 = vmatpush.msra.mxu2 %v525_v53  ;;  %v550_v13 = vsel %vm549_vm4, 1, %v1232_v11  ;;  %vm1077_vm8 = vmneg %vm549_vm4 }
  0xd7   : > { %1063 = vmatpush.xpose.msk.msra.mxu1 %vm555_vm3, %v544_v48  ;;  %778 = vmatpush.msra.mxu3 %v541_v54  ;;  %v551_v14 = vrot.slane %v550_v13, 1  ;;  %v737_v48 = vld [vmem:[#allocation4] sm:$0x1] }
  0xd8   : > { %759 = vmatpush.msra.mxu2 %v524_v55 }
  0xd9   : > { %779 = vmatpush.msra.mxu3 %v540_v56  ;;  %vm1480_vm6 = vcmp.ne.s32.totalorder %v551_v14, 0 }
  0xda   : > { %1047 = vmatpush.xpose.msk.msra.mxu0 %vm555_vm3, %v527_v49  ;;  %760 = vmatpush.msra.mxu2 %v523_v57  ;;  %vm1079_vm9 = vmneg %vm1480_vm6 }
  0xdb   : > { %1064 = vmatpush.xpose.msk.msra.mxu1 %vm555_vm3, %v543_v50  ;;  %780 = vmatpush.msra.mxu3 %v539_v58 }
  0xdc   : > { %761 = vmatpush.msra.mxu2 %v522_v59 }
  0xdd   : > { %781 = vmatpush.msra.mxu3 %v538_v60 }
  0xde   : > { %1048 = vmatpush.xpose.msk.msra.mxu0 %vm555_vm3, %v526_v51  ;;  %762 = vmatpush.msra.mxu2 %v521_v61 }
  0xdf   : > { %1065 = vmatpush.xpose.msk.msra.mxu1 %vm555_vm3, %v542_v52  ;;  %782 = vmatpush.msra.mxu3 %v537_v62 }
  0xe0   : > { %763 = vmatpush.msra.mxu2 %v520_v63 }
  0xe1   : > { %783 = vmatpush.msra.mxu3 %v536_v0 }
  0xe2   : > { %1049 = vmatpush.xpose.msk.msra.mxu0 %vm555_vm3, %v525_v53  ;;  %764 = vmatpush.msra.mxu2 %v519_v1  ;;  %v738_v53 = vld [vmem:[#allocation4 + $0x1] sm:$0x1] }
  0xe3   : > { %1066 = vmatpush.xpose.msk.msra.mxu1 %vm555_vm3, %v541_v54  ;;  %784 = vmatpush.msra.mxu3 %v535_v2 }
  0xe4   : > { %765 = vmatpush.msra.mxu2 %v518_v3 }
  0xe5   : > { %785 = vmatpush.msra.mxu3 %v534_v5 }
  0xe6   : > { %1050 = vmatpush.xpose.msk.msra.mxu0 %vm555_vm3, %v524_v55  ;;  %766 = vmatpush.msra.mxu2 %v517_v4 }
  0xe7   : > { %1067 = vmatpush.xpose.msk.msra.mxu1 %vm555_vm3, %v540_v56  ;;  %786 = vmatpush.msra.mxu3 %v533_v7 }
  0xe8   : > { %767 = vmatpush.msra.mxu2 %v516_v6 }
  0xe9   : > { %787 = vmatpush.msra.mxu3 %v532_v8 }
  0xea   : > { %1051 = vmatpush.xpose.msk.msra.mxu0 %vm555_vm3, %v523_v57 }
  0xeb   : > { %1068 = vmatpush.xpose.msk.msra.mxu1 %vm555_vm3, %v539_v58  ;;  %v792_v58 = vld [vmem:[#allocation5] sm:$0x1] }
  0xee   : > { %1052 = vmatpush.xpose.msk.msra.mxu0 %vm555_vm3, %v522_v59 }
  0xef   : > { %1069 = vmatpush.xpose.msk.msra.mxu1 %vm555_vm3, %v538_v60 }
  0xf2   : > { %1053 = vmatpush.xpose.msk.msra.mxu0 %vm555_vm3, %v521_v61 }
  0xf3   : > { %1070 = vmatpush.xpose.msk.msra.mxu1 %vm555_vm3, %v537_v62 }
  0xf6   : > { %1054 = vmatpush.xpose.msk.msra.mxu0 %vm555_vm3, %v520_v63 }
  0xf7   : > { %1071 = vmatpush.xpose.msk.msra.mxu1 %vm555_vm3, %v536_v0  ;;  %v793_v0 = vld [vmem:[#allocation5 + $0x1] sm:$0x1] }
  0xfa   : > { %1055 = vmatpush.xpose.msk.msra.mxu0 %vm555_vm3, %v519_v1 }
  0xfb   : > { %1072 = vmatpush.xpose.msk.msra.mxu1 %vm555_vm3, %v535_v2 }
  0xfe   : > { %1056 = vmatpush.xpose.msk.msra.mxu0 %vm555_vm3, %v518_v3 }
  0xff   : > { %1073 = vmatpush.xpose.msk.msra.mxu1 %vm555_vm3, %v534_v5 }
 0x102   : > { %1057 = vmatpush.xpose.msk.msra.mxu0 %vm555_vm3, %v517_v4 }
 0x103   : > { %1074 = vmatpush.xpose.msk.msra.mxu1 %vm555_vm3, %v533_v7 }
 0x106   : > { %1058 = vmatpush.xpose.msk.msra.mxu0 %vm555_vm3, %v516_v6 }
 0x107   : > { %1075 = vmatpush.xpose.msk.msra.mxu1 %vm555_vm3, %v532_v8 }
 0x109   : > { %1059 = vmatmul.msk.f32.vlgmr.msra.gmra.mxu0 %vm555_vm3, %v553_v9 }
 0x10a   : > { %1076 = vmatmul.msk.f32.vlgmr.msra.gmra.mxu1 %vm555_vm3, %v554_v10 }
 0x186   : > { %v624_v15 = vpop.f32.mrf.mxu0 }
 0x187   : > { %v700_v16 = vsel %vm549_vm4, -1e+30, %v624_v15  ;;  %v695_v19 = vpop.f32.mrf.mxu1 }
 0x188   : > { %v703_v17 = vsel %vm702_vm5, %v700_v16, -inf  ;;  %v701_v20 = vsel %vm1480_vm6, -1e+30, %v695_v19 }
 0x189   : > { %704 = vmax.xlane.f32.xlu0 %v703_v17  ;;  %v706_v21 = vsel %vm702_vm5, %v701_v20, -inf }
 0x191   : > { %707 = vmax.xlane.f32.xlu0 %v706_v21 }
 0x1fc   : > { %v705_v23 = vpop.xlane.xlu0 %704 }
 0x1fd   : > { %v709_v24 = vmax.f32 %v698_v22, %v705_v23 }
 0x1ff   : > { %v711_v25 = vsub.f32 %v698_v22, %v709_v24  ;;  %813 = vst.msk [vmem:[#allocation3] sm:$0x1] %vm749_vm7, %v709_v24  ;;  %719 = vperm.xlu1 %1140, %v709_v24  }
 0x201   : > { %v713_v26 = vmul.f32 1.442695, %v711_v25 }
 0x203   : > { %1143 = vpow2.f32 %v713_v26 }
 0x204   : > { %v708_v28 = vpop.xlane.xlu0 %707 }
 0x205   : > { %v710_v29 = vmax.f32 %v699_v27, %v708_v28 }
 0x207   : > { %v712_v30 = vsub.f32 %v699_v27, %v710_v29  ;;  %814 = vst.msk [vmem:[#allocation3 + $0x1] sm:$0x1] %vm749_vm7, %v710_v29  ;;  %725 = vperm.xlu1 %1140, %v710_v29  }
 0x209   : > { %v1144_v31 = vpop.eup %1143  ;;  %v715_v32 = vmul.f32 1.442695, %v712_v30 }
 0x20a   : > { %796 = vperm.xlu2 %1141, %v1144_v31   ;;  %v739_v49 = vmul.f32 %v1144_v31, %v737_v48 }
 0x20b   : > { %1145 = vpow2.f32 %v715_v32 }
 0x211   : > { %v1146_v33 = vpop.eup %1145 }
 0x212   : > { %802 = vperm.xlu2 %1141, %v1146_v33   ;;  %v740_v54 = vmul.f32 %v1146_v33, %v738_v53 }
 0x264   : > { %v797_v52 = vpop.permute.xlu2 %796 }
 0x265   : > { %v799_v56 = vperm.slane %v797_v52, 0 }
 0x267   : > { %v806_v59 = vmul.f32 %v799_v56, %v792_v58 }
 0x26c   : > { %v803_v60 = vpop.permute.xlu2 %802 }
 0x26d   : > { %v805_v63 = vperm.slane %v803_v60, 0 }
 0x26f   : > { %v807_v1 = vmul.f32 %v805_v63, %v793_v0 }
 0x271   : > { %v720_v34 = vpop.permute.xlu1 %719 }
 0x272   : > { %v722_v35 = vperm.slane %v720_v34, 0 }
 0x274   : > { %v729_v36 = vsub.f32 %v624_v15, %v722_v35 }
 0x276   : > { %v731_v37 = vmul.f32 1.442695, %v729_v36 }
 0x278   : > { %1147 = vpow2.f32 %v731_v37 }
 0x279   : > { %v726_v38 = vpop.permute.xlu1 %725 }
 0x27a   : > { %v728_v39 = vperm.slane %v726_v38, 0 }
 0x27c   : > { %v730_v40 = vsub.f32 %v695_v19, %v728_v39 }
 0x27e   : > { %v1148_v41 = vpop.eup %1147  ;;  %v733_v42 = vmul.f32 1.442695, %v730_v40 }
 0x27f   : > { %1078 = vmatmul.msk.f32.vlgmr.msra.gmra.mxu2 %vm1077_vm8, %v1148_v41  ;;  %v735_v43 = vsel %vm549_vm4, 0.0, %v1148_v41 }
 0x280   : > { %1149 = vpow2.f32 %v733_v42  ;;  %v741_v44 = vsel %vm702_vm5, %v735_v43, 0.0 }
 0x281   : > { %742 = vadd.xlane.f32.xlu0 %v741_v44 }
 0x286   : > { %v1150_v45 = vpop.eup %1149 }
 0x287   : > { %1080 = vmatmul.msk.f32.vlgmr.msra.gmra.mxu3 %vm1079_vm9, %v1150_v45  ;;  %v736_v46 = vsel %vm1480_vm6, 0.0, %v1150_v45 }
 0x288   : > { %v744_v47 = vsel %vm702_vm5, %v736_v46, 0.0 }
 0x289   : > { %745 = vadd.xlane.f32.xlu1 %v744_v47 }
 0x2f4   : > { %v743_v50 = vpop.xlane.xlu0 %742 }
 0x2f5   : > { %v747_v51 = vadd.f32 %v743_v50, %v739_v49 }
 0x2f7   : > { %750 = vst.msk [vmem:[#allocation4] sm:$0x1] %vm749_vm7, %v747_v51 }
 0x2fc   : > { %v746_v55 = vpop.xlane.xlu1 %745 }
 0x2fd   : > { %v748_v57 = vadd.f32 %v746_v55, %v740_v54 }
 0x2ff   : > { %751 = vst.msk [vmem:[#allocation4 + $0x1] sm:$0x1] %vm749_vm7, %v748_v57 }
 0x302   : > { %v769_v61 = vpop.f32.mrf.mxu2 }
 0x303   : > { %v808_v62 = vadd.f32 %v806_v59, %v769_v61 }
 0x305   : > { %811 = vst.msk [vmem:[#allocation5] sm:$0x1] %vm810_vm10, %v808_v62 }
 0x309   : > { %818 = sbr.rel (%p1081_p11) target bundleno = 1071 (0x42f), region = 90 }
 0x30a   : > { %v789_v2 = vpop.f32.mrf.mxu3 }
 0x30b   : > { %v809_v3 = vadd.f32 %v807_v1, %v789_v2 }
 0x30d   : > { %812 = vst.msk [vmem:[#allocation5 + $0x1] sm:$0x1] %vm810_vm10, %v809_v3 }
 0x30e   : > { %v819_v4 = vld [vmem:[#allocation4] sm:$0x1]  ;;  %v820_v5 = vld [vmem:[#allocation4 + $0x1] sm:$0x1]  ;;  %v1233_v6 = vmov 0   ;;  %v873_v27 = vld [vmem:[%s1554_s5 + $0x18] sm:$0xff] }
 0x30f   : > { %1151 = vset.pattern.permute.xlu0 %v1233_v6  ;;  %1152 = vrcp.f32 %v819_v4  ;;  %v832_v10 = vand.u32 2147483648, %v819_v4  ;;  %vm826_vm11 = vweird.f32 %v819_v4  ;;  %v830_v13 = vand.u32 2147483647, %v819_v4  ;;  %v868_v28 = vld [vmem:[%s1553_s4 + $0x18] sm:$0xff]  ;;  %v872_v29 = vld [vmem:[%s1554_s5 + $0x10] sm:$0xff]  ;;  %889 = vmatpush.msra.mxu0 %v873_v27  ;;  %v871_v31 = vld [vmem:[%s1554_s5 + $0x8] sm:$0xff] }
 0x310   : > { %1154 = vrcp.f32 %v820_v5  ;;  %vm840_vm15 = vweird.f32 %v820_v5  ;;  %v846_v19 = vand.u32 2147483648, %v820_v5  ;;  %v844_v22 = vand.u32 2147483647, %v820_v5  ;;  %917 = vmatpush.msra.mxu1 %v868_v28  ;;  %v867_v30 = vld [vmem:[%s1553_s4 + $0x10] sm:$0xff]  ;;  %v866_v32 = vld [vmem:[%s1553_s4 + $0x8] sm:$0xff]  ;;  %v870_v33 = vld [vmem:[%s1554_s5] sm:$0xff] }
 0x311   : > { %v833_v16 = vor.u32 1.1754944e-38, %v832_v10  ;;  %vm831_vm14 = vcmp.eq.f32.partialorder %v830_v13, 8.507059e+37  ;;  %890 = vmatpush.msra.mxu0 %v872_v29  ;;  %v865_v34 = vld [vmem:[%s1553_s4] sm:$0xff]  ;;  %v849_v36 = vld [vmem:[#allocation5] sm:$0x1]  ;;  %vm926_vm4 = vcmask 254976  }
 0x312   : > { %v847_v24 = vor.u32 1.1754944e-38, %v846_v19  ;;  %vm845_vm2 = vcmp.eq.f32.partialorder %v844_v22, 8.507059e+37  ;;  %918 = vmatpush.msra.mxu1 %v867_v30  ;;  %v869_v35 = vld [vmem:[%s1549_s0] sm:$0x3] }
 0x313   : > { %891 = vmatpush.msra.mxu0 %v871_v31 }
 0x314   : > { %919 = vmatpush.msra.mxu1 %v866_v32  ;;  %v850_v40 = vld [vmem:[#allocation5 + $0x1] sm:$0x1] }
 0x315   : > { %v1153_v7 = vpop.eup %1152  ;;  %892 = vmatpush.msra.mxu0 %v870_v33 }
 0x316   : > { %v1155_v8 = vpop.eup %1154  ;;  %v822_v9 = vmul.f32 %v1153_v7, %v819_v4  ;;  %vm827_vm12 = vweird.f32 %v1153_v7  ;;  %920 = vmatpush.msra.mxu1 %v865_v34  ;;  %1082 = vmatmul.msk.f32.vlgmr.msra.gmra.mxu0 %vm555_vm3, %v869_v35 }
 0x317   : > { %v836_v11 = vmul.f32 %v1155_v8, %v820_v5  ;;  %vm828_vm13 = vmor %vm826_vm11, %vm827_vm12  ;;  %vm841_vm0 = vweird.f32 %v1155_v8 }
 0x318   : > { %v823_v12 = vsub.f32 1.0, %v822_v9  ;;  %vm842_vm1 = vmor %vm840_vm15, %vm841_vm0 }
 0x319   : > { %v837_v14 = vsub.f32 1.0, %v836_v11 }
 0x31a   : > { %v824_v15 = vmul.f32 %v1153_v7, %v823_v12 }
 0x31b   : > { %v838_v17 = vmul.f32 %v1155_v8, %v837_v14 }
 0x31c   : > { %v825_v18 = vadd.f32 %v1153_v7, %v824_v15 }
 0x31d   : > { %v839_v21 = vadd.f32 %v1155_v8, %v838_v17 }
 0x31e   : > { %v829_v20 = vsel %vm828_vm13, %v1153_v7, %v825_v18 }
 0x31f   : > { %v834_v23 = vsel %vm831_vm14, %v833_v16, %v829_v20  ;;  %v843_v25 = vsel %vm842_vm1, %v1155_v8, %v839_v21 }
 0x320   : > { %853 = vperm.xlu0 %1151, %v834_v23   ;;  %v848_v26 = vsel %vm845_vm2, %v847_v24, %v843_v25 }
 0x328   : > { %859 = vperm.xlu0 %1151, %v848_v26  }
 0x392   : > { %v854_v37 = vpop.permute.xlu0 %853 }
 0x393   : > { %v856_v38 = vperm.slane %v854_v37, 0  ;;  %v894_v45 = vpop.f32.mrf.mxu0 }
 0x395   : > { %v863_v39 = vmul.f32 %v856_v38, %v849_v36 }
 0x397   : > { %899 = vst [vmem:[#allocation1] ss:$9 sm:$0xff] %v863_v39 }
 0x39a   : > { %v860_v41 = vpop.permute.xlu0 %859 }
 0x39b   : > { %v862_v42 = vperm.slane %v860_v41, 0 }
 0x39d   : > { %v864_v43 = vmul.f32 %v862_v42, %v850_v40 }
 0x39f   : > { %901 = vst [vmem:[#allocation1 + $0x1] ss:$9 sm:$0xff] %v864_v43 }
 0x3a6   : > { %v902_v44 = vld [vmem:[#allocation1] sm:$0xff] }
 0x3a7   : > { %1083 = vmatmul.msk.f32.vlgmr.msra.gmra.mxu1 %vm555_vm3, %v902_v44 }
 0x424   : > { %v922_v46 = vpop.f32.mrf.mxu1 }
 0x425   : > { %v923_v47 = vadd.f32 %v922_v46, %v894_v45 }
 0x427   : > { %1156 = vtanh.f32 %v923_v47 }
 0x42d   : > { %v1157_v48 = vpop.eup %1156 }
 0x42e   : > { %927 = vst.msk [vmem:[#allocation7] sm:$0x3] %vm926_vm4, %v1157_v48 }
 0x42f PF: > { %p1093_p12 = scmp.eq.s32.totalorder %s1031_s26, 1  ;;  %s938_s16 = sshll.u32 %s1555_s6, 4  ;;  %s939_s16 = int_to_ptr.hbm [resolvable:$true] %s938_s16 }
 0x430   : > { %s1234_s17 = smov [#allocation7]  }
 0x431   : > { %s936_s18 = sshll.u32 %s1234_s17, 4  ;;  %s937_s18 = int_to_ptr.vmem [resolvable:$true] %s936_s18 }
 0x432   : > { %1090 = dma.vmem_to_hbm [thread:$0]  (%p1093_p12), %s937_s18, 32, %s939_s16, [#allocation8]  }
 0x433   : > { %1207 = dma.done.wait (%p1093_p12), [#allocation8], 32  }
 0x434   : > { %1209 = vsyncadd (%p1093_p12), [#allocation8], 4294967264 }
 0x435 PF: > { %s17_s25 = sadd.s32 1, %s1228_s25   ;;  %s1558_s21 = smov %s1216_s22 }
 0x436   : > { %p14_p13 = scmp.ge.s32.totalorder %s17_s25, 4   ;;  %s1559_s22 = smov %s1306_s30 }
 0x437   : > { %s1560_s23 = smov %s1224_s24  ;;  %s1561_s24 = smov %s1563_s27 }
 0x438   :  { %16 = sbr.rel (!%p14_p13) target bundleno = 3 (0x3), region = 130 }
 0x43d   :  { %952 = vsyncpa [#allocation8], 1 }
 0x43e   :  { %954 = vsyncpa [#allocation8 + $0x1], 1 }

</bundles_post_ra>
